<compile_context>
chip_gen: v5e
topology: v5e:2x2
jax: 0.10.0
libtpu: 0.0.40
codegen_flags: <defaults>
</compile_context>

<pallas_src>
import jax
import jax.numpy as jnp
from jax.experimental import pallas as pl
from jax.experimental.pallas import tpu as pltpu

HIDDEN = 768   # fixed by nn.Linear(768, num_class)
LANE = 128     # TPU vreg lane width


def _round_up(x, m):
    return ((x + m - 1) // m) * m


def _head_kernel(x_ref, w_ref, b_ref, o_ref):
    # x_ref: [tb, 768] (transformer dtype)   w_ref: [768, tn] bf16
    # b_ref: [1, tn] f32                     o_ref: [tb, tn] f32
    x = x_ref[...].astype(jnp.bfloat16)                      # bf16 MXU operand
    y = jnp.dot(x, w_ref[...], preferred_element_type=jnp.float32)  # f32 accumulate
    o_ref[...] = y + b_ref[...]                              # f32 bias add (VPU)


def prepare_classifier_params(weight_hc, bias_c):
    """One-time prep (model init): bf16 weight + zero-pad classes to a 128 multiple.

    weight_hc: [768, C] (transposed PyTorch nn.Linear weight), bias_c: [C].
    Returns (w_padded_bf16 [768, Cp], bias_padded_f32 [1, Cp], C).
    """
    assert weight_hc.shape[0] == HIDDEN
    C = weight_hc.shape[1]
    c_pad = _round_up(C, LANE)
    w_p = jnp.pad(weight_hc.astype(jnp.bfloat16), ((0, 0), (0, c_pad - C)))
    b_p = jnp.pad(bias_c.astype(jnp.float32), (0, c_pad - C)).reshape(1, c_pad)
    return w_p, b_p, C


def transformer_head_classify(last_hidden_state, w_p, b_p, num_class):
    """y = last_hidden_state[:, 0] @ W + b, with W/b pre-prepared by
    `prepare_classifier_params`."""
    B, S, H = last_hidden_state.shape
    assert H == HIDDEN
    c_pad = w_p.shape[1]

    # Free, contiguous reshape: the first 768-wide column block of each row of
    # x2d is exactly the CLS token, so the BlockSpec DMA fetches only B*768
    # elements of the [B, S, 768] transformer output.
    x2d = last_hidden_state.reshape(B, S * H)

    # Batch tile: 16-row aligned (full bf16 vreg packing); split into >=2 grid
    # points for moderate/large B so v7x's second TensorCore gets work.  Tiny
    # batches use one exact block (block dim == array dim, no ragged edge).
    if B <= 16:
        tb = B
    else:
        tb = min(512, _round_up((B + 1) // 2, 16))

    # Class tile: stream the weight per class tile so large num_class never
    # exceeds scoped VMEM on any generation; c_pad is a multiple of 128.
    tn = min(512, c_pad)

    grid = (pl.cdiv(B, tb), pl.cdiv(c_pad, tn))

    flops = 2 * B * HIDDEN * c_pad
    bytes_accessed = (
        B * HIDDEN * last_hidden_state.dtype.itemsize  # CLS rows read
        + HIDDEN * c_pad * 2                           # bf16 weight read
        + c_pad * 4                                    # f32 bias read
        + B * c_pad * 4                                # f32 logits written
    )

    out = pl.pallas_call(
        _head_kernel,
        out_shape=jax.ShapeDtypeStruct((B, c_pad), jnp.float32),
        grid=grid,
        in_specs=[
            pl.BlockSpec((tb, HIDDEN), lambda i, j: (i, 0)),   # CLS rows only
            pl.BlockSpec((HIDDEN, tn), lambda i, j: (0, j)),   # weight class tile
            pl.BlockSpec((1, tn), lambda i, j: (0, j)),        # bias class tile
        ],
        out_specs=pl.BlockSpec((tb, tn), lambda i, j: (i, j)),
        compiler_params=pltpu.CompilerParams(
            dimension_semantics=("parallel", "parallel"),
        ),
        cost_estimate=pl.CostEstimate(
            flops=flops, transcendentals=0, bytes_accessed=bytes_accessed
        ),
    )(x2d, w_p, b_p)

    # Drop the zero-padded class columns.
    return out[:, :num_class]


if __name__ == "__main__":
    key = jax.random.PRNGKey(0)
    k_h, k_w, k_b = jax.random.split(key, 3)

    B, S, C = 2, 8, 10  # small batch, short sequence, 10 classes

    # Synthetic "transformer output" (what self.transformer(**kwargs) would return).
    last_hidden_state = jax.random.normal(k_h, (B, S, HIDDEN), dtype=jnp.float32)

    # Deterministic classifier parameters (nn.Linear(768, num_class) shapes).
    # PyTorch stores weight as [C, H]; we keep the transposed [H, C] layout.
    w_pt = jax.random.normal(k_w, (C, HIDDEN), dtype=jnp.float32) * 0.02
    bias = jax.random.normal(k_b, (C,), dtype=jnp.float32) * 0.02
    w_hc = w_pt.T

    # One-time (model-init) parameter prep — hoisted out of the per-call path.
    w_p, b_p, num_class = prepare_classifier_params(w_hc, bias)

    y = transformer_head_classify(last_hidden_state, w_p, b_p, num_class)
    y = jax.block_until_ready(y)
    assert y.shape == (B, C)

    # Tight check against a bf16-matmul / f32-accumulate reference (same arithmetic).
    cls = last_hidden_state[:, 0]
    y_ref_bf16 = jnp.dot(
        cls.astype(jnp.bfloat16), w_hc.astype(jnp.bfloat16),
        preferred_element_type=jnp.float32,
    ) + bias
    assert jnp.allclose(y, y_ref_bf16, atol=1e-5, rtol=1e-5)

    # Loose semantic check against the full-f32 reference (bf16 rounding only).
    y_ref_f32 = cls @ w_hc + bias
    assert jnp.allclose(y, y_ref_f32, atol=2e-2, rtol=2e-2)

    print("KERNEL_OK")
</pallas_src>

<mosaic_0001>
module attributes {stable_mosaic.version = 11 : i64} {
  func.func @_head_kernel(%arg0: i32, %arg1: i32, %arg2: memref<2x768xf32, #tpu.memory_space<vmem>>, %arg3: memref<768x128xbf16, #tpu.memory_space<vmem>>, %arg4: memref<1x128xf32, #tpu.memory_space<vmem>>, %arg5: memref<2x128xf32, #tpu.memory_space<vmem>>) attributes {dimension_semantics = [#tpu.dimension_semantics<parallel>, #tpu.dimension_semantics<parallel>], iteration_bounds = array<i64: 1, 1>, scalar_prefetch = 0 : i64, scratch_operands = 0 : i64, tpu.core_type = #tpu.core_type<tc>, window_params = [{transform_indices = @transform_0, window_bounds = array<i64: 2, 768>}, {transform_indices = @transform_1, window_bounds = array<i64: 768, 128>}, {transform_indices = @transform_2, window_bounds = array<i64: 1, 128>}, {transform_indices = @transform_3, window_bounds = array<i64: 2, 128>}]} {
    %c0 = arith.constant 0 : index
    %c0_0 = arith.constant 0 : index
    %0 = vector.load %arg2[%c0, %c0_0] : memref<2x768xf32, #tpu.memory_space<vmem>>, vector<2x768xf32>
    %1 = arith.truncf %0 : vector<2x768xf32> to vector<2x768xbf16>
    %c0_1 = arith.constant 0 : index
    %c0_2 = arith.constant 0 : index
    %2 = vector.load %arg3[%c0_1, %c0_2] : memref<768x128xbf16, #tpu.memory_space<vmem>>, vector<768x128xbf16>
    %cst = arith.constant dense<0.000000e+00> : vector<2x128xf32>
    %3 = tpu.matmul %1, %2, %cst {dimension_numbers = #tpu.dot_dimension_numbers<[1], [0], [0], [1], [0, 0, 1, 1], [], []>} : vector<2x768xbf16>, vector<768x128xbf16>, vector<2x128xf32> -> vector<2x128xf32>
    %c0_3 = arith.constant 0 : index
    %c0_4 = arith.constant 0 : index
    %4 = vector.load %arg4[%c0_3, %c0_4] : memref<1x128xf32, #tpu.memory_space<vmem>>, vector<1x128xf32>
    %5 = vector.broadcast %4 : vector<1x128xf32> to vector<2x128xf32>
    %6 = arith.addf %3, %5 : vector<2x128xf32>
    %c0_5 = arith.constant 0 : index
    %c0_6 = arith.constant 0 : index
    %7 = vector.load %arg5[%c0_5, %c0_6] : memref<2x128xf32, #tpu.memory_space<vmem>>, vector<2x128xf32>
    tpu.vector_store %arg5[%c0_5, %c0_6], %6 {strides = array<i32>} : memref<2x128xf32, #tpu.memory_space<vmem>>, vector<2x128xf32>,
    return
  }
  func.func @transform_0(%arg0: i32, %arg1: i32) -> (i32, i32) {
    %c0_i32 = arith.constant 0 : i32
    %c0_i32_0 = arith.constant 0 : i32
    return %arg0, %c0_i32 : i32, i32
  }
  func.func @transform_1(%arg0: i32, %arg1: i32) -> (i32, i32) {
    %c0_i32 = arith.constant 0 : i32
    %c0_i32_0 = arith.constant 0 : i32
    return %c0_i32, %arg1 : i32, i32
  }
  func.func @transform_2(%arg0: i32, %arg1: i32) -> (i32, i32) {
    %c0_i32 = arith.constant 0 : i32
    %c0_i32_0 = arith.constant 0 : i32
    return %c0_i32, %arg1 : i32, i32
  }
  func.func @transform_3(%arg0: i32, %arg1: i32) -> (i32, i32) {
    %c0_i32 = arith.constant 0 : i32
    return %arg0, %arg1 : i32, i32
  }
}

</mosaic_0001>

<bundles_post_ra>
// kernel: tpu_custom_call.1
= control target key start
LH: loop header
LB: loop body
LE: loop exit
PB: predicated region body
PF: predicated region fallthrough
CT: control target
= control target key end

     0   :  { %8 = vsyncpa [#allocation3], 0  ;;  %s916_s0 = inlined_call_operand.hbm [shape: f32[2,6144], index: 0, kind: input, shape index: {}]   ;;  %s917_s1 = inlined_call_operand.hbm [shape: bf16[768,128], index: 1, kind: input, shape index: {}]   ;;  %s918_s2 = inlined_call_operand.vmem [shape: f32[1,128], index: 2, kind: input, shape index: {}]   ;;  %s919_s3 = inlined_call_operand.hbm [shape: f32[2,128], index: 3, kind: output, shape index: {}]  }
   0x1   :  { %9 = vsyncpa [#allocation6], 0 }
   0x2   :  { %10 = vsyncpa [#allocation4], 0  ;;  %s16_s14 = sshll.u32 %s916_s0, 4  ;;  %s879_s15 = smov [#allocation2]   ;;  %s17_s14 = int_to_ptr.hbm [resolvable:$true] %s16_s14 }
   0x3   :  { %s18_s16 = sshll.u32 %s879_s15, 4  ;;  %s26_s19 = sshll.u32 %s917_s1, 4  ;;  %s19_s16 = int_to_ptr.vmem [resolvable:$true] %s18_s16  ;;  %s27_s19 = int_to_ptr.hbm [resolvable:$true] %s26_s19 }
   0x4   :  { %21 = dma.hbm_to_vmem [thread:$0]  %s17_s14, 192, %s19_s16, [#allocation3]  }
   0x5   :  { %s880_s20 = smov [#allocation5]   ;;  %s881_s22 = smov 64  }
   0x6   :  { %s28_s21 = sshll.u32 %s880_s20, 4  ;;  %s882_s23 = smov 4   ;;  %s29_s21 = int_to_ptr.vmem [resolvable:$true] %s28_s21 }
   0x7   :  { %34 = dma.hbm_to_vmem [thread:$0]  %s27_s19, 6144, %s29_s21, [#allocation6], %s881_s22, %s881_s22, %s882_s23  }
   0x8   :  { %873 = dma.done.wait [#allocation3], 192  }
   0x9   :  { %874 = vsyncadd [#allocation3], 4294967104 }
   0xa   :  { %875 = dma.done.wait [#allocation6], 6144  }
   0xb   :  { %876 = vsyncadd [#allocation6], 4294961152  ;;  %v754_v0 = vld [vmem:[#allocation5 + $0x38] sm:$0xff]  ;;  %v753_v2 = vld [vmem:[#allocation5 + $0x30] sm:$0xff]  ;;  %s883_s24 = smov [#allocation7]   ;;  %s544_s28 = sshll.u32 %s919_s3, 4  ;;  %s545_s28 = int_to_ptr.hbm [resolvable:$true] %s544_s28 }
   0xc   :  { %v762_v1 = vld [vmem:[#allocation5 + $0x78] sm:$0xff]  ;;  %458 = vmatpush.bf16.msra.mxu0 %v754_v0  ;;  %v761_v3 = vld [vmem:[#allocation5 + $0x70] sm:$0xff]  ;;  %v752_v8 = vld [vmem:[#allocation5 + $0x28] sm:$0xff]  ;;  %s542_s25 = sshll.u32 %s883_s24, 4  ;;  %s543_s25 = int_to_ptr.vmem [resolvable:$true] %s542_s25 }
   0xd   :  { %471 = vmatpush.bf16.msra.mxu1 %v762_v1  ;;  %v770_v4 = vld [vmem:[#allocation5 + $0xb8] sm:$0xff]  ;;  %v769_v6 = vld [vmem:[#allocation5 + $0xb0] sm:$0xff]  ;;  %v760_v9 = vld [vmem:[#allocation5 + $0x68] sm:$0xff] }
   0xe   :  { %v778_v5 = vld [vmem:[#allocation5 + $0xf8] sm:$0xff]  ;;  %484 = vmatpush.bf16.msra.mxu2 %v770_v4  ;;  %v777_v7 = vld [vmem:[#allocation5 + $0xf0] sm:$0xff]  ;;  %v768_v10 = vld [vmem:[#allocation5 + $0xa8] sm:$0xff] }
   0xf   :  { %497 = vmatpush.bf16.msra.mxu3 %v778_v5  ;;  %v776_v11 = vld [vmem:[#allocation5 + $0xe8] sm:$0xff]  ;;  %v751_v12 = vld [vmem:[#allocation5 + $0x20] sm:$0xff]  ;;  %v45_v14 = vld [vmem:[#allocation2] sm:$0xff] }
  0x10   :  { %459 = vmatpush.bf16.msra.mxu0 %v753_v2  ;;  %v759_v13 = vld [vmem:[#allocation5 + $0x60] sm:$0xff]  ;;  %49 = vst [vmem:[#allocation1] ss:$4 sm:$0xff] %v45_v14  ;;  %v750_v17 = vld [vmem:[#allocation5 + $0x18] sm:$0xff]  ;;  %v749_v21 = vld [vmem:[#allocation5 + $0x10] sm:$0xff] }
  0x11   :  { %472 = vmatpush.bf16.msra.mxu1 %v761_v3  ;;  %v767_v15 = vld [vmem:[#allocation5 + $0xa0] sm:$0xff]  ;;  %v758_v18 = vld [vmem:[#allocation5 + $0x58] sm:$0xff]  ;;  %v757_v22 = vld [vmem:[#allocation5 + $0x50] sm:$0xff] }
  0x12   :  { %485 = vmatpush.bf16.msra.mxu2 %v769_v6  ;;  %v775_v16 = vld [vmem:[#allocation5 + $0xe0] sm:$0xff]  ;;  %v766_v19 = vld [vmem:[#allocation5 + $0x98] sm:$0xff]  ;;  %v765_v23 = vld [vmem:[#allocation5 + $0x90] sm:$0xff] }
  0x13   :  { %498 = vmatpush.bf16.msra.mxu3 %v777_v7  ;;  %v774_v20 = vld [vmem:[#allocation5 + $0xd8] sm:$0xff]  ;;  %v773_v24 = vld [vmem:[#allocation5 + $0xd0] sm:$0xff]  ;;  %v748_v26 = vld [vmem:[#allocation5 + $0x8] sm:$0xff] }
  0x14   :  { %460 = vmatpush.bf16.msra.mxu0 %v752_v8  ;;  %v46_v25 = vld [vmem:[#allocation2 + $0x8] sm:$0xf]  ;;  %v756_v27 = vld [vmem:[#allocation5 + $0x48] sm:$0xff]  ;;  %v747_v30 = vld [vmem:[#allocation5] sm:$0xff] }
  0x15   :  { %473 = vmatpush.bf16.msra.mxu1 %v760_v9  ;;  %51 = vst [vmem:[#allocation1 + $0x20] ss:$4 sm:$0xff] %v46_v25  ;;  %v764_v28 = vld [vmem:[#allocation5 + $0x88] sm:$0xff]  ;;  %v755_v31 = vld [vmem:[#allocation5 + $0x40] sm:$0xff]  ;;  %v786_v34 = vld [vmem:[#allocation5 + $0x138] sm:$0xff] }
  0x16   :  { %486 = vmatpush.bf16.msra.mxu2 %v768_v10  ;;  %v772_v29 = vld [vmem:[#allocation5 + $0xc8] sm:$0xff]  ;;  %v794_v35 = vld [vmem:[#allocation5 + $0x178] sm:$0xff]  ;;  %v763_v36 = vld [vmem:[#allocation5 + $0x80] sm:$0xff] }
  0x17   :  { %499 = vmatpush.bf16.msra.mxu3 %v776_v11  ;;  %v52_v32 = vld.sshfl [vmem:[#allocation1] sm:$0xff pattern:$0x73625140]  ;;  %v53_v33 = vld.sshfl [vmem:[#allocation1 + $0x8] sm:$0xff pattern:$0x73625140] }
  0x18   :  { %461 = vmatpush.bf16.msra.mxu0 %v751_v12  ;;  %v771_v37 = vld [vmem:[#allocation5 + $0xc0] sm:$0xff]  ;;  %v64_v38 = vpack.c.bf16 %v52_v32, %v52_v32  ;;  %v65_v39 = vpack.c.bf16 %v53_v33, %v53_v33  ;;  %v785_v42 = vld [vmem:[#allocation5 + $0x130] sm:$0xff]  ;;  %v784_v46 = vld [vmem:[#allocation5 + $0x128] sm:$0xff] }
  0x19   :  { %474 = vmatpush.bf16.msra.mxu1 %v759_v13  ;;  %v54_v40 = vld.sshfl [vmem:[#allocation1 + $0x10] sm:$0xff pattern:$0x73625140]  ;;  %v55_v41 = vld.sshfl [vmem:[#allocation1 + $0x18] sm:$0xff pattern:$0x73625140] }
  0x1a   :  { %487 = vmatpush.bf16.msra.mxu2 %v767_v15  ;;  %v793_v43 = vld [vmem:[#allocation5 + $0x170] sm:$0xff]  ;;  %v66_v44 = vpack.c.bf16 %v54_v40, %v54_v40  ;;  %v67_v45 = vpack.c.bf16 %v55_v41, %v55_v41  ;;  %v792_v47 = vld [vmem:[#allocation5 + $0x168] sm:$0xff]  ;;  %v783_v48 = vld [vmem:[#allocation5 + $0x120] sm:$0xff] }
  0x1b   :  { %500 = vmatpush.bf16.msra.mxu3 %v775_v16  ;;  %v791_v49 = vld [vmem:[#allocation5 + $0x160] sm:$0xff]  ;;  %v782_v50 = vld [vmem:[#allocation5 + $0x118] sm:$0xff]  ;;  %v781_v52 = vld [vmem:[#allocation5 + $0x110] sm:$0xff] }
  0x1c   :  { %462 = vmatpush.bf16.msra.mxu0 %v750_v17  ;;  %v790_v51 = vld [vmem:[#allocation5 + $0x158] sm:$0xff]  ;;  %v789_v53 = vld [vmem:[#allocation5 + $0x150] sm:$0xff]  ;;  %v780_v54 = vld [vmem:[#allocation5 + $0x108] sm:$0xff] }
  0x1d   :  { %475 = vmatpush.bf16.msra.mxu1 %v758_v18  ;;  %v788_v55 = vld [vmem:[#allocation5 + $0x148] sm:$0xff]  ;;  %v779_v56 = vld [vmem:[#allocation5 + $0x100] sm:$0xff]  ;;  %v57_v59 = vld.sshfl [vmem:[#allocation1 + $0x28] sm:$0xff pattern:$0x73625140] }
  0x1e   :  { %488 = vmatpush.bf16.msra.mxu2 %v766_v19  ;;  %v787_v57 = vld [vmem:[#allocation5 + $0x140] sm:$0xff]  ;;  %v56_v58 = vld.sshfl [vmem:[#allocation1 + $0x20] sm:$0xff pattern:$0x73625140]  ;;  %v69_v61 = vpack.c.bf16 %v57_v59, %v57_v59 }
  0x1f   :  { %501 = vmatpush.bf16.msra.mxu3 %v774_v20  ;;  %v68_v60 = vpack.c.bf16 %v56_v58, %v56_v58  ;;  %v800_v4 = vld [vmem:[%s918_s2] ss:$0 sm:$0xff] }
  0x20   :  { %463 = vmatpush.bf16.msra.mxu0 %v749_v21 }
  0x21   :  { %476 = vmatpush.bf16.msra.mxu1 %v757_v22 }
  0x22   :  { %489 = vmatpush.bf16.msra.mxu2 %v765_v23 }
  0x23   :  { %502 = vmatpush.bf16.msra.mxu3 %v773_v24 }
  0x24   :  { %464 = vmatpush.bf16.msra.mxu0 %v748_v26 }
  0x25   :  { %477 = vmatpush.bf16.msra.mxu1 %v756_v27 }
  0x26   :  { %490 = vmatpush.bf16.msra.mxu2 %v764_v28 }
  0x27   :  { %503 = vmatpush.bf16.msra.mxu3 %v772_v29 }
  0x28   :  { %465 = vmatpush.bf16.msra.mxu0 %v747_v30 }
  0x29   :  { %478 = vmatpush.bf16.msra.mxu1 %v755_v31 }
  0x2a   :  { %491 = vmatpush.bf16.msra.mxu2 %v763_v36 }
  0x2b   :  { %504 = vmatpush.bf16.msra.mxu3 %v771_v37  ;;  %466 = vmatmul.bf16.vlgmr.msra.gmra.mxu0 %v64_v38 }
  0x2c   :  { %510 = vmatpush.bf16.msrb.mxu0 %v786_v34  ;;  %479 = vmatmul.bf16.vlgmr.msra.gmra.mxu1 %v65_v39 }
  0x2d   :  { %523 = vmatpush.bf16.msrb.mxu1 %v794_v35  ;;  %492 = vmatmul.bf16.vlgmr.msra.gmra.mxu2 %v66_v44 }
  0x2e   :  { %505 = vmatmul.bf16.vlgmr.msra.gmra.mxu3 %v67_v45 }
  0x30   :  { %511 = vmatpush.bf16.msrb.mxu0 %v785_v42 }
  0x31   :  { %524 = vmatpush.bf16.msrb.mxu1 %v793_v43 }
  0x34   :  { %512 = vmatpush.bf16.msrb.mxu0 %v784_v46 }
  0x35   :  { %525 = vmatpush.bf16.msrb.mxu1 %v792_v47 }
  0x38   :  { %513 = vmatpush.bf16.msrb.mxu0 %v783_v48 }
  0x39   :  { %526 = vmatpush.bf16.msrb.mxu1 %v791_v49 }
  0x3c   :  { %514 = vmatpush.bf16.msrb.mxu0 %v782_v50 }
  0x3d   :  { %527 = vmatpush.bf16.msrb.mxu1 %v790_v51 }
  0x40   :  { %515 = vmatpush.bf16.msrb.mxu0 %v781_v52 }
  0x41   :  { %528 = vmatpush.bf16.msrb.mxu1 %v789_v53 }
  0x44   :  { %516 = vmatpush.bf16.msrb.mxu0 %v780_v54 }
  0x45   :  { %529 = vmatpush.bf16.msrb.mxu1 %v788_v55 }
  0x48   :  { %517 = vmatpush.bf16.msrb.mxu0 %v779_v56 }
  0x49   :  { %530 = vmatpush.bf16.msrb.mxu1 %v787_v57 }
  0x4b   :  { %518 = vmatmul.bf16.vlgmr.msrb.gmra.mxu0 %v68_v60 }
  0x4c   :  { %531 = vmatmul.bf16.vlgmr.msrb.gmra.mxu1 %v69_v61 }
  0xa8   :  { %v467_v62 = vpop.f32.mrf.mxu0 }
  0xa9   :  { %v480_v63 = vpop.f32.mrf.mxu1  ;;  %v468_v5 = vadd.f32 %v800_v4, %v467_v62 }
  0xab   :  { %v481_v8 = vadd.f32 %v480_v63, %v468_v5 }
  0xb0   :  { %v469_v0 = vpop.f32.mrf.mxu0  ;;  %v493_v2 = vpop.f32.mrf.mxu2 }
  0xb1   :  { %v482_v1 = vpop.f32.mrf.mxu1  ;;  %v506_v3 = vpop.f32.mrf.mxu3  ;;  %v494_v9 = vadd.f32 %v493_v2, %v481_v8 }
  0xb3   :  { %v507_v10 = vadd.f32 %v506_v3, %v494_v9 }
  0xb8   :  { %v495_v6 = vpop.f32.mrf.mxu2 }
  0xb9   :  { %v508_v7 = vpop.f32.mrf.mxu3 }
  0xc8   :  { %v519_v11 = vpop.f32.mrf.mxu0 }
  0xc9   :  { %v532_v12 = vpop.f32.mrf.mxu1  ;;  %v520_v13 = vadd.f32 %v519_v11, %v507_v10 }
  0xcb   :  { %v533_v14 = vadd.f32 %v532_v12, %v520_v13 }
  0xcd   :  { %536 = vst [vmem:[#allocation7] sm:$0x3] %v533_v14 }
  0xce   :  { %547 = dma.vmem_to_hbm [thread:$0]  %s543_s25, 32, %s545_s28, [#allocation4]  }
  0xd0   :  { %v521_v15 = vpop.f32.mrf.mxu0 }
  0xd1   :  { %v534_v16 = vpop.f32.mrf.mxu1 }
  0xd2   :  { %877 = dma.done.wait [#allocation4], 32  }
  0xd3   :  { %878 = vsyncadd [#allocation4], 4294967264 }
  0xd4   :  { %552 = vsyncpa [#allocation3], 1 }
  0xd5   :  { %553 = vsyncpa [#allocation6], 1 }
  0xd6   :  { %554 = vsyncpa [#allocation4], 1 }

</bundles_post_ra>
